<compile_context>
chip_gen: v7x
topology: tpu7x:2x2x1
jax: 0.10.0
libtpu: 0.0.40
codegen_flags: <defaults>
</compile_context>

<pallas_src>
import jax
import jax.numpy as jnp
from jax import lax
from jax.experimental import pallas as pl
from jax.experimental.pallas import tpu as pltpu


# ----------------------------- Pallas GRU kernel -----------------------------

def gru_encoder_kernel(emb_ref, dlt_ref, wih_ref, wdl_ref, whh_ref,
                       bcomb_ref, bhn_ref, out_ref):
    """Whole GRU sequence in one invocation.

    emb_ref:   (T, B, E)  time-major embedded inputs
    dlt_ref:   (T, B, 1)  time deltas (the would-be extra input column)
    wih_ref:   (E, 3H)    input->gates weights (delta row split off)
    wdl_ref:   (1, 3H)    delta row of the input->gates weights
    whh_ref:   (H, 3H)    hidden->gates weights
    bcomb_ref: (1, 3H)    [b_ih_r+b_hh_r | b_ih_z+b_hh_z | b_ih_n]
    bhn_ref:   (1, H)     b_hh_n (applied inside the r-gated term)
    out_ref:   (B, T*H)   lane-dense output; out[:, t*H:(t+1)*H] = h_t
    """
    T, B, _ = emb_ref.shape
    H = whh_ref.shape[0]

    w_ih = wih_ref[...]     # (E, 3H) resident in vregs
    w_dl = wdl_ref[...]     # (1, 3H)
    w_hh = whh_ref[...]     # (H, 3H)
    b_c = bcomb_ref[...]    # (1, 3H)
    b_hn = bhn_ref[...]     # (1, H)

    h = jnp.zeros((B, H), jnp.float32)      # hidden state carried in registers

    # T is small & static: fully unrolled loop -> all static indexing, full
    # LLO scheduler visibility, no per-step grid/DMA overhead.
    for t in range(T):
        x = emb_ref[t]                      # (B, E)
        d = dlt_ref[t]                      # (B, 1)

        # Fused input-side gates: MXU matmul + rank-1 delta contribution (VPU).
        gi = (jnp.dot(x, w_ih, preferred_element_type=jnp.float32)
              + d * w_dl + b_c)             # (B, 3H)
        # Fused hidden-side gates.
        gh = jnp.dot(h, w_hh, preferred_element_type=jnp.float32)   # (B, 3H)

        r = jax.nn.sigmoid(gi[:, :H] + gh[:, :H])
        z = jax.nn.sigmoid(gi[:, H:2 * H] + gh[:, H:2 * H])
        n = jnp.tanh(gi[:, 2 * H:] + r * (gh[:, 2 * H:] + b_hn))
        h = (1.0 - z) * n + z * h

        out_ref[:, t * H:(t + 1) * H] = h   # static lane-offset store


def gru_pallas(emb_tbe, dlt_tb1, w_ih_e, w_dl, w_hh_cat, b_comb, b_hn):
    """emb_tbe: (T,B,E), dlt_tb1: (T,B,1) -> (B, T*H) lane-dense output slab."""
    T, B, _ = emb_tbe.shape
    H = w_hh_cat.shape[0]
    vmem = pl.BlockSpec(memory_space=pltpu.MemorySpace.VMEM)
    return pl.pallas_call(
        gru_encoder_kernel,
        out_shape=jax.ShapeDtypeStruct((B, T * H), jnp.float32),
        in_specs=[vmem] * 7,
        out_specs=vmem,
    )(emb_tbe, dlt_tb1, w_ih_e, w_dl, w_hh_cat, b_comb, b_hn)


# ----------------------------- Encoder forward --------------------------------

@jax.jit
def encoder_forward(raw_features, embedding_table, w_ih, w_hh, b_ih, b_hh):
    """Mirror of Encoder.forward (eval mode).

    raw_features: (B, 2*K) float32, each history step is (node_id, delta).
    w_ih: (3, E+1, E), w_hh: (3, E, E), b_ih/b_hh: (3, 1, E); gate order (r,z,n).
    Returns: (B, K, E) float32 (batch_first GRU outputs, all timesteps).
    """
    B, k2 = raw_features.shape
    K = k2 // 2
    E = w_hh.shape[-1]

    rf = raw_features.reshape(B, K, 2)
    ids_tb = rf[:, :, 0].astype(jnp.int32).T + 1      # (K, B) time-major ids (+1 shift)
    dlt_tb1 = rf[:, :, 1].T[:, :, None]               # (K, B, 1) time-major deltas
    emb_tbe = embedding_table[ids_tb]                 # (K, B, E) gather (wrapper glue)
    # dropout: identity (eval mode)

    # --- fuse GRU parameters for the kernel (constant reshuffles under jit) ---
    w_ih_cat = jnp.concatenate([w_ih[0], w_ih[1], w_ih[2]], axis=-1)    # (E+1, 3E)
    w_ih_e = w_ih_cat[:E]                                               # (E, 3E)
    w_dl = w_ih_cat[E:E + 1]                                            # (1, 3E) delta row
    w_hh_cat = jnp.concatenate([w_hh[0], w_hh[1], w_hh[2]], axis=-1)    # (E, 3E)
    b_comb = jnp.concatenate(
        [b_ih[0] + b_hh[0], b_ih[1] + b_hh[1], b_ih[2]], axis=-1)       # (1, 3E)
    b_hn = b_hh[2]                                                      # (1, E)

    out_flat = gru_pallas(emb_tbe, dlt_tb1, w_ih_e, w_dl, w_hh_cat,
                          b_comb, b_hn)                                 # (B, K*E)
    return out_flat.reshape(B, K, E)                                    # batch-first


# ----------------------------- Pure-JAX reference ------------------------------

def gru_reference(x_bti, w_ih, w_hh, b_ih, b_hh):
    B, T, _ = x_bti.shape
    H = w_hh.shape[-1]
    h0 = jnp.zeros((B, H), jnp.float32)

    def step(h, xt):
        i_r = xt @ w_ih[0] + b_ih[0]
        i_z = xt @ w_ih[1] + b_ih[1]
        i_n = xt @ w_ih[2] + b_ih[2]
        h_r = h @ w_hh[0] + b_hh[0]
        h_z = h @ w_hh[1] + b_hh[1]
        h_n = h @ w_hh[2] + b_hh[2]
        r = jax.nn.sigmoid(i_r + h_r)
        z = jax.nn.sigmoid(i_z + h_z)
        n = jnp.tanh(i_n + r * h_n)
        h_new = (1.0 - z) * n + z * h
        return h_new, h_new

    _, outs = lax.scan(step, h0, jnp.transpose(x_bti, (1, 0, 2)))
    return jnp.transpose(outs, (1, 0, 2))


# ----------------------------- main --------------------------------------------

if __name__ == "__main__":
    batch_size = 4
    embedding_size = 32          # E (GRU hidden size)
    history_size = 8             # K (sequence length)
    num_nodes = 16
    input_size = embedding_size + 1

    key = jax.random.PRNGKey(0)
    k_ids, k_dt, k_emb, k_wih, k_whh, k_bih, k_bhh = jax.random.split(key, 7)

    # raw_features: interleaved (node_id, delta) pairs as a float tensor.
    node_ids = jax.random.randint(k_ids, (batch_size, history_size), 0, num_nodes)
    deltas = jax.random.uniform(k_dt, (batch_size, history_size), jnp.float32)
    raw_features = jnp.stack(
        [node_ids.astype(jnp.float32), deltas], axis=-1
    ).reshape(batch_size, 2 * history_size)                      # (B, 2*K)

    # Table has num_nodes + 1 rows because forward shifts ids by +1.
    bound = 1.0 / jnp.sqrt(jnp.float32(embedding_size))
    embedding_table = jax.random.normal(
        k_emb, (num_nodes + 1, embedding_size), jnp.float32) * 0.1
    w_ih = jax.random.uniform(k_wih, (3, input_size, embedding_size), jnp.float32, -bound, bound)
    w_hh = jax.random.uniform(k_whh, (3, embedding_size, embedding_size), jnp.float32, -bound, bound)
    b_ih = jax.random.uniform(k_bih, (3, 1, embedding_size), jnp.float32, -bound, bound)
    b_hh = jax.random.uniform(k_bhh, (3, 1, embedding_size), jnp.float32, -bound, bound)

    out = encoder_forward(raw_features, embedding_table, w_ih, w_hh, b_ih, b_hh)
    out = jax.block_until_ready(out)
    assert out.shape == (batch_size, history_size, embedding_size), out.shape

    # Correctness check against a pure-JAX GRU (PyTorch gate semantics).
    rf = raw_features.reshape(batch_size, history_size, 2)
    ids = rf[:, :, 0].astype(jnp.int32) + 1
    x_ref = jnp.concatenate(
        [embedding_table[ids], rf[:, :, 1:2]], axis=-1
    ).astype(jnp.float32)
    ref = gru_reference(x_ref, w_ih, w_hh, b_ih, b_hh)
    assert jnp.allclose(out, ref, atol=1e-5, rtol=1e-5), (
        float(jnp.max(jnp.abs(out - ref)))
    )

    print("KERNEL_OK")
</pallas_src>

<mosaic_0001>
module attributes {stable_mosaic.version = 11 : i64} {
  func.func @gru_encoder_kernel(%arg0: memref<8x4x32xf32, #tpu.memory_space<vmem>>, %arg1: memref<8x4x1xf32, #tpu.memory_space<vmem>>, %arg2: memref<32x96xf32, #tpu.memory_space<vmem>>, %arg3: memref<1x96xf32, #tpu.memory_space<vmem>>, %arg4: memref<32x96xf32, #tpu.memory_space<vmem>>, %arg5: memref<1x96xf32, #tpu.memory_space<vmem>>, %arg6: memref<1x32xf32, #tpu.memory_space<vmem>>, %arg7: memref<4x256xf32, #tpu.memory_space<vmem>>) attributes {dimension_semantics = [], scalar_prefetch = 0 : i64, scratch_operands = 0 : i64, tpu.core_type = #tpu.core_type<tc>} {
    %c0 = arith.constant 0 : index
    %c0_0 = arith.constant 0 : index
    %0 = vector.load %arg2[%c0, %c0_0] : memref<32x96xf32, #tpu.memory_space<vmem>>, vector<32x96xf32>
    %c0_1 = arith.constant 0 : index
    %c0_2 = arith.constant 0 : index
    %1 = vector.load %arg3[%c0_1, %c0_2] : memref<1x96xf32, #tpu.memory_space<vmem>>, vector<1x96xf32>
    %c0_3 = arith.constant 0 : index
    %c0_4 = arith.constant 0 : index
    %2 = vector.load %arg4[%c0_3, %c0_4] : memref<32x96xf32, #tpu.memory_space<vmem>>, vector<32x96xf32>
    %c0_5 = arith.constant 0 : index
    %c0_6 = arith.constant 0 : index
    %3 = vector.load %arg5[%c0_5, %c0_6] : memref<1x96xf32, #tpu.memory_space<vmem>>, vector<1x96xf32>
    %c0_7 = arith.constant 0 : index
    %c0_8 = arith.constant 0 : index
    %4 = vector.load %arg6[%c0_7, %c0_8] : memref<1x32xf32, #tpu.memory_space<vmem>>, vector<1x32xf32>
    %cst = arith.constant 0.000000e+00 : f32
    %5 = vector.broadcast %cst : f32 to vector<4x32xf32>
    %c0_9 = arith.constant 0 : index
    %c0_10 = arith.constant 0 : index
    %c0_11 = arith.constant 0 : index
    %6 = vector.load %arg0[%c0_9, %c0_10, %c0_11] : memref<8x4x32xf32, #tpu.memory_space<vmem>>, vector<1x4x32xf32>
    %7 = vector.shape_cast %6 : vector<1x4x32xf32> to vector<4x32xf32>
    %c0_12 = arith.constant 0 : index
    %c0_13 = arith.constant 0 : index
    %c0_14 = arith.constant 0 : index
    %8 = vector.load %arg1[%c0_12, %c0_13, %c0_14] : memref<8x4x1xf32, #tpu.memory_space<vmem>>, vector<1x4x1xf32>
    %9 = vector.shape_cast %8 : vector<1x4x1xf32> to vector<4x1xf32>
    %cst_15 = arith.constant dense<0.000000e+00> : vector<4x96xf32>
    %10 = tpu.matmul %7, %0, %cst_15 {dimension_numbers = #tpu.dot_dimension_numbers<[1], [0], [0], [1], [0, 0, 1, 1], [], []>} : vector<4x32xf32>, vector<32x96xf32>, vector<4x96xf32> -> vector<4x96xf32>
    %11 = vector.broadcast %9 : vector<4x1xf32> to vector<4x96xf32>
    %12 = vector.broadcast %1 : vector<1x96xf32> to vector<4x96xf32>
    %13 = arith.mulf %11, %12 : vector<4x96xf32>
    %14 = arith.addf %10, %13 : vector<4x96xf32>
    %15 = vector.broadcast %3 : vector<1x96xf32> to vector<4x96xf32>
    %16 = arith.addf %14, %15 : vector<4x96xf32>
    %cst_16 = arith.constant dense<0.000000e+00> : vector<4x96xf32>
    %17 = tpu.matmul %5, %2, %cst_16 {dimension_numbers = #tpu.dot_dimension_numbers<[1], [0], [0], [1], [0, 0, 1, 1], [], []>} : vector<4x32xf32>, vector<32x96xf32>, vector<4x96xf32> -> vector<4x96xf32>
    %18 = vector.extract_strided_slice %16 {offsets = [0, 0], sizes = [4, 32], strides = [1, 1]} : vector<4x96xf32> to vector<4x32xf32>
    %19 = vector.extract_strided_slice %17 {offsets = [0, 0], sizes = [4, 32], strides = [1, 1]} : vector<4x96xf32> to vector<4x32xf32>
    %20 = arith.addf %18, %19 : vector<4x32xf32>
    %21 = arith.negf %20 : vector<4x32xf32>
    %22 = math.exp %21 : vector<4x32xf32>
    %cst_17 = arith.constant 1.000000e+00 : f32
    %23 = vector.broadcast %cst_17 : f32 to vector<4x32xf32>
    %24 = arith.addf %23, %22 : vector<4x32xf32>
    %25 = arith.divf %23, %24 : vector<4x32xf32>
    %26 = vector.extract_strided_slice %16 {offsets = [0, 32], sizes = [4, 32], strides = [1, 1]} : vector<4x96xf32> to vector<4x32xf32>
    %27 = vector.extract_strided_slice %17 {offsets = [0, 32], sizes = [4, 32], strides = [1, 1]} : vector<4x96xf32> to vector<4x32xf32>
    %28 = arith.addf %26, %27 : vector<4x32xf32>
    %29 = arith.negf %28 : vector<4x32xf32>
    %30 = math.exp %29 : vector<4x32xf32>
    %cst_18 = arith.constant 1.000000e+00 : f32
    %31 = vector.broadcast %cst_18 : f32 to vector<4x32xf32>
    %32 = arith.addf %31, %30 : vector<4x32xf32>
    %33 = arith.divf %31, %32 : vector<4x32xf32>
    %34 = vector.extract_strided_slice %16 {offsets = [0, 64], sizes = [4, 32], strides = [1, 1]} : vector<4x96xf32> to vector<4x32xf32>
    %35 = vector.extract_strided_slice %17 {offsets = [0, 64], sizes = [4, 32], strides = [1, 1]} : vector<4x96xf32> to vector<4x32xf32>
    %36 = vector.broadcast %4 : vector<1x32xf32> to vector<4x32xf32>
    %37 = arith.addf %35, %36 : vector<4x32xf32>
    %38 = arith.mulf %25, %37 : vector<4x32xf32>
    %39 = arith.addf %34, %38 : vector<4x32xf32>
    %40 = math.tanh %39 : vector<4x32xf32>
    %cst_19 = arith.constant 1.000000e+00 : f32
    %41 = vector.broadcast %cst_19 : f32 to vector<4x32xf32>
    %42 = arith.subf %41, %33 : vector<4x32xf32>
    %43 = arith.mulf %42, %40 : vector<4x32xf32>
    %44 = arith.mulf %33, %5 : vector<4x32xf32>
    %45 = arith.addf %43, %44 : vector<4x32xf32>
    %c0_20 = arith.constant 0 : index
    %c0_21 = arith.constant 0 : index
    %46 = vector.load %arg7[%c0_20, %c0_21] : memref<4x256xf32, #tpu.memory_space<vmem>>, vector<4x32xf32>
    tpu.vector_store %arg7[%c0_20, %c0_21], %45 {strides = array<i32>} : memref<4x256xf32, #tpu.memory_space<vmem>>, vector<4x32xf32>,
    %c1 = arith.constant 1 : index
    %c0_22 = arith.constant 0 : index
    %c0_23 = arith.constant 0 : index
    %47 = vector.load %arg0[%c1, %c0_22, %c0_23] : memref<8x4x32xf32, #tpu.memory_space<vmem>>, vector<1x4x32xf32>
    %48 = vector.shape_cast %47 : vector<1x4x32xf32> to vector<4x32xf32>
    %c1_24 = arith.constant 1 : index
    %c0_25 = arith.constant 0 : index
    %c0_26 = arith.constant 0 : index
    %49 = vector.load %arg1[%c1_24, %c0_25, %c0_26] : memref<8x4x1xf32, #tpu.memory_space<vmem>>, vector<1x4x1xf32>
    %50 = vector.shape_cast %49 : vector<1x4x1xf32> to vector<4x1xf32>
    %cst_27 = arith.constant dense<0.000000e+00> : vector<4x96xf32>
    %51 = tpu.matmul %48, %0, %cst_27 {dimension_numbers = #tpu.dot_dimension_numbers<[1], [0], [0], [1], [0, 0, 1, 1], [], []>} : vector<4x32xf32>, vector<32x96xf32>, vector<4x96xf32> -> vector<4x96xf32>
    %52 = vector.broadcast %50 : vector<4x1xf32> to vector<4x96xf32>
    %53 = vector.broadcast %1 : vector<1x96xf32> to vector<4x96xf32>
    %54 = arith.mulf %52, %53 : vector<4x96xf32>
    %55 = arith.addf %51, %54 : vector<4x96xf32>
    %56 = vector.broadcast %3 : vector<1x96xf32> to vector<4x96xf32>
    %57 = arith.addf %55, %56 : vector<4x96xf32>
    %cst_28 = arith.constant dense<0.000000e+00> : vector<4x96xf32>
    %58 = tpu.matmul %45, %2, %cst_28 {dimension_numbers = #tpu.dot_dimension_numbers<[1], [0], [0], [1], [0, 0, 1, 1], [], []>} : vector<4x32xf32>, vector<32x96xf32>, vector<4x96xf32> -> vector<4x96xf32>
    %59 = vector.extract_strided_slice %57 {offsets = [0, 0], sizes = [4, 32], strides = [1, 1]} : vector<4x96xf32> to vector<4x32xf32>
    %60 = vector.extract_strided_slice %58 {offsets = [0, 0], sizes = [4, 32], strides = [1, 1]} : vector<4x96xf32> to vector<4x32xf32>
    %61 = arith.addf %59, %60 : vector<4x32xf32>
    %62 = arith.negf %61 : vector<4x32xf32>
    %63 = math.exp %62 : vector<4x32xf32>
    %cst_29 = arith.constant 1.000000e+00 : f32
    %64 = vector.broadcast %cst_29 : f32 to vector<4x32xf32>
    %65 = arith.addf %64, %63 : vector<4x32xf32>
    %66 = arith.divf %64, %65 : vector<4x32xf32>
    %67 = vector.extract_strided_slice %57 {offsets = [0, 32], sizes = [4, 32], strides = [1, 1]} : vector<4x96xf32> to vector<4x32xf32>
    %68 = vector.extract_strided_slice %58 {offsets = [0, 32], sizes = [4, 32], strides = [1, 1]} : vector<4x96xf32> to vector<4x32xf32>
    %69 = arith.addf %67, %68 : vector<4x32xf32>
    %70 = arith.negf %69 : vector<4x32xf32>
    %71 = math.exp %70 : vector<4x32xf32>
    %cst_30 = arith.constant 1.000000e+00 : f32
    %72 = vector.broadcast %cst_30 : f32 to vector<4x32xf32>
    %73 = arith.addf %72, %71 : vector<4x32xf32>
    %74 = arith.divf %72, %73 : vector<4x32xf32>
    %75 = vector.extract_strided_slice %57 {offsets = [0, 64], sizes = [4, 32], strides = [1, 1]} : vector<4x96xf32> to vector<4x32xf32>
    %76 = vector.extract_strided_slice %58 {offsets = [0, 64], sizes = [4, 32], strides = [1, 1]} : vector<4x96xf32> to vector<4x32xf32>
    %77 = vector.broadcast %4 : vector<1x32xf32> to vector<4x32xf32>
    %78 = arith.addf %76, %77 : vector<4x32xf32>
    %79 = arith.mulf %66, %78 : vector<4x32xf32>
    %80 = arith.addf %75, %79 : vector<4x32xf32>
    %81 = math.tanh %80 : vector<4x32xf32>
    %cst_31 = arith.constant 1.000000e+00 : f32
    %82 = vector.broadcast %cst_31 : f32 to vector<4x32xf32>
    %83 = arith.subf %82, %74 : vector<4x32xf32>
    %84 = arith.mulf %83, %81 : vector<4x32xf32>
    %85 = arith.mulf %74, %45 : vector<4x32xf32>
    %86 = arith.addf %84, %85 : vector<4x32xf32>
    %c0_32 = arith.constant 0 : index
    %c32 = arith.constant 32 : index
    %87 = vector.load %arg7[%c0_32, %c32] : memref<4x256xf32, #tpu.memory_space<vmem>>, vector<4x32xf32>
    tpu.vector_store %arg7[%c0_32, %c32], %86 {strides = array<i32>} : memref<4x256xf32, #tpu.memory_space<vmem>>, vector<4x32xf32>,
    %c2 = arith.constant 2 : index
    %c0_33 = arith.constant 0 : index
    %c0_34 = arith.constant 0 : index
    %88 = vector.load %arg0[%c2, %c0_33, %c0_34] : memref<8x4x32xf32, #tpu.memory_space<vmem>>, vector<1x4x32xf32>
    %89 = vector.shape_cast %88 : vector<1x4x32xf32> to vector<4x32xf32>
    %c2_35 = arith.constant 2 : index
    %c0_36 = arith.constant 0 : index
    %c0_37 = arith.constant 0 : index
    %90 = vector.load %arg1[%c2_35, %c0_36, %c0_37] : memref<8x4x1xf32, #tpu.memory_space<vmem>>, vector<1x4x1xf32>
    %91 = vector.shape_cast %90 : vector<1x4x1xf32> to vector<4x1xf32>
    %cst_38 = arith.constant dense<0.000000e+00> : vector<4x96xf32>
    %92 = tpu.matmul %89, %0, %cst_38 {dimension_numbers = #tpu.dot_dimension_numbers<[1], [0], [0], [1], [0, 0, 1, 1], [], []>} : vector<4x32xf32>, vector<32x96xf32>, vector<4x96xf32> -> vector<4x96xf32>
    %93 = vector.broadcast %91 : vector<4x1xf32> to vector<4x96xf32>
    %94 = vector.broadcast %1 : vector<1x96xf32> to vector<4x96xf32>
    %95 = arith.mulf %93, %94 : vector<4x96xf32>
    %96 = arith.addf %92, %95 : vector<4x96xf32>
    %97 = vector.broadcast %3 : vector<1x96xf32> to vector<4x96xf32>
    %98 = arith.addf %96, %97 : vector<4x96xf32>
    %cst_39 = arith.constant dense<0.000000e+00> : vector<4x96xf32>
    %99 = tpu.matmul %86, %2, %cst_39 {dimension_numbers = #tpu.dot_dimension_numbers<[1], [0], [0], [1], [0, 0, 1, 1], [], []>} : vector<4x32xf32>, vector<32x96xf32>, vector<4x96xf32> -> vector<4x96xf32>
    %100 = vector.extract_strided_slice %98 {offsets = [0, 0], sizes = [4, 32], strides = [1, 1]} : vector<4x96xf32> to vector<4x32xf32>
    %101 = vector.extract_strided_slice %99 {offsets = [0, 0], sizes = [4, 32], strides = [1, 1]} : vector<4x96xf32> to vector<4x32xf32>
    %102 = arith.addf %100, %101 : vector<4x32xf32>
    %103 = arith.negf %102 : vector<4x32xf32>
    %104 = math.exp %103 : vector<4x32xf32>
    %cst_40 = arith.constant 1.000000e+00 : f32
    %105 = vector.broadcast %cst_40 : f32 to vector<4x32xf32>
    %106 = arith.addf %105, %104 : vector<4x32xf32>
    %107 = arith.divf %105, %106 : vector<4x32xf32>
    %108 = vector.extract_strided_slice %98 {offsets = [0, 32], sizes = [4, 32], strides = [1, 1]} : vector<4x96xf32> to vector<4x32xf32>
    %109 = vector.extract_strided_slice %99 {offsets = [0, 32], sizes = [4, 32], strides = [1, 1]} : vector<4x96xf32> to vector<4x32xf32>
    %110 = arith.addf %108, %109 : vector<4x32xf32>
    %111 = arith.negf %110 : vector<4x32xf32>
    %112 = math.exp %111 : vector<4x32xf32>
    %cst_41 = arith.constant 1.000000e+00 : f32
    %113 = vector.broadcast %cst_41 : f32 to vector<4x32xf32>
    %114 = arith.addf %113, %112 : vector<4x32xf32>
    %115 = arith.divf %113, %114 : vector<4x32xf32>
    %116 = vector.extract_strided_slice %98 {offsets = [0, 64], sizes = [4, 32], strides = [1, 1]} : vector<4x96xf32> to vector<4x32xf32>
    %117 = vector.extract_strided_slice %99 {offsets = [0, 64], sizes = [4, 32], strides = [1, 1]} : vector<4x96xf32> to vector<4x32xf32>
    %118 = vector.broadcast %4 : vector<1x32xf32> to vector<4x32xf32>
    %119 = arith.addf %117, %118 : vector<4x32xf32>
    %120 = arith.mulf %107, %119 : vector<4x32xf32>
    %121 = arith.addf %116, %120 : vector<4x32xf32>
    %122 = math.tanh %121 : vector<4x32xf32>
    %cst_42 = arith.constant 1.000000e+00 : f32
    %123 = vector.broadcast %cst_42 : f32 to vector<4x32xf32>
    %124 = arith.subf %123, %115 : vector<4x32xf32>
    %125 = arith.mulf %124, %122 : vector<4x32xf32>
    %126 = arith.mulf %115, %86 : vector<4x32xf32>
    %127 = arith.addf %125, %126 : vector<4x32xf32>
    %c0_43 = arith.constant 0 : index
    %c64 = arith.constant 64 : index
    %128 = vector.load %arg7[%c0_43, %c64] : memref<4x256xf32, #tpu.memory_space<vmem>>, vector<4x32xf32>
    tpu.vector_store %arg7[%c0_43, %c64], %127 {strides = array<i32>} : memref<4x256xf32, #tpu.memory_space<vmem>>, vector<4x32xf32>,
    %c3 = arith.constant 3 : index
    %c0_44 = arith.constant 0 : index
    %c0_45 = arith.constant 0 : index
    %129 = vector.load %arg0[%c3, %c0_44, %c0_45] : memref<8x4x32xf32, #tpu.memory_space<vmem>>, vector<1x4x32xf32>
    %130 = vector.shape_cast %129 : vector<1x4x32xf32> to vector<4x32xf32>
    %c3_46 = arith.constant 3 : index
    %c0_47 = arith.constant 0 : index
    %c0_48 = arith.constant 0 : index
    %131 = vector.load %arg1[%c3_46, %c0_47, %c0_48] : memref<8x4x1xf32, #tpu.memory_space<vmem>>, vector<1x4x1xf32>
    %132 = vector.shape_cast %131 : vector<1x4x1xf32> to vector<4x1xf32>
    %cst_49 = arith.constant dense<0.000000e+00> : vector<4x96xf32>
    %133 = tpu.matmul %130, %0, %cst_49 {dimension_numbers = #tpu.dot_dimension_numbers<[1], [0], [0], [1], [0, 0, 1, 1], [], []>} : vector<4x32xf32>, vector<32x96xf32>, vector<4x96xf32> -> vector<4x96xf32>
    %134 = vector.broadcast %132 : vector<4x1xf32> to vector<4x96xf32>
    %135 = vector.broadcast %1 : vector<1x96xf32> to vector<4x96xf32>
    %136 = arith.mulf %134, %135 : vector<4x96xf32>
    %137 = arith.addf %133, %136 : vector<4x96xf32>
    %138 = vector.broadcast %3 : vector<1x96xf32> to vector<4x96xf32>
    %139 = arith.addf %137, %138 : vector<4x96xf32>
    %cst_50 = arith.constant dense<0.000000e+00> : vector<4x96xf32>
    %140 = tpu.matmul %127, %2, %cst_50 {dimension_numbers = #tpu.dot_dimension_numbers<[1], [0], [0], [1], [0, 0, 1, 1], [], []>} : vector<4x32xf32>, vector<32x96xf32>, vector<4x96xf32> -> vector<4x96xf32>
    %141 = vector.extract_strided_slice %139 {offsets = [0, 0], sizes = [4, 32], strides = [1, 1]} : vector<4x96xf32> to vector<4x32xf32>
    %142 = vector.extract_strided_slice %140 {offsets = [0, 0], sizes = [4, 32], strides = [1, 1]} : vector<4x96xf32> to vector<4x32xf32>
    %143 = arith.addf %141, %142 : vector<4x32xf32>
    %144 = arith.negf %143 : vector<4x32xf32>
    %145 = math.exp %144 : vector<4x32xf32>
    %cst_51 = arith.constant 1.000000e+00 : f32
    %146 = vector.broadcast %cst_51 : f32 to vector<4x32xf32>
    %147 = arith.addf %146, %145 : vector<4x32xf32>
    %148 = arith.divf %146, %147 : vector<4x32xf32>
    %149 = vector.extract_strided_slice %139 {offsets = [0, 32], sizes = [4, 32], strides = [1, 1]} : vector<4x96xf32> to vector<4x32xf32>
    %150 = vector.extract_strided_slice %140 {offsets = [0, 32], sizes = [4, 32], strides = [1, 1]} : vector<4x96xf32> to vector<4x32xf32>
    %151 = arith.addf %149, %150 : vector<4x32xf32>
    %152 = arith.negf %151 : vector<4x32xf32>
    %153 = math.exp %152 : vector<4x32xf32>
    %cst_52 = arith.constant 1.000000e+00 : f32
    %154 = vector.broadcast %cst_52 : f32 to vector<4x32xf32>
    %155 = arith.addf %154, %153 : vector<4x32xf32>
    %156 = arith.divf %154, %155 : vector<4x32xf32>
    %157 = vector.extract_strided_slice %139 {offsets = [0, 64], sizes = [4, 32], strides = [1, 1]} : vector<4x96xf32> to vector<4x32xf32>
    %158 = vector.extract_strided_slice %140 {offsets = [0, 64], sizes = [4, 32], strides = [1, 1]} : vector<4x96xf32> to vector<4x32xf32>
    %159 = vector.broadcast %4 : vector<1x32xf32> to vector<4x32xf32>
    %160 = arith.addf %158, %159 : vector<4x32xf32>
    %161 = arith.mulf %148, %160 : vector<4x32xf32>
    %162 = arith.addf %157, %161 : vector<4x32xf32>
    %163 = math.tanh %162 : vector<4x32xf32>
    %cst_53 = arith.constant 1.000000e+00 : f32
    %164 = vector.broadcast %cst_53 : f32 to vector<4x32xf32>
    %165 = arith.subf %164, %156 : vector<4x32xf32>
    %166 = arith.mulf %165, %163 : vector<4x32xf32>
    %167 = arith.mulf %156, %127 : vector<4x32xf32>
    %168 = arith.addf %166, %167 : vector<4x32xf32>
    %c0_54 = arith.constant 0 : index
    %c96 = arith.constant 96 : index
    %169 = vector.load %arg7[%c0_54, %c96] : memref<4x256xf32, #tpu.memory_space<vmem>>, vector<4x32xf32>
    tpu.vector_store %arg7[%c0_54, %c96], %168 {strides = array<i32>} : memref<4x256xf32, #tpu.memory_space<vmem>>, vector<4x32xf32>,
    %c4 = arith.constant 4 : index
    %c0_55 = arith.constant 0 : index
    %c0_56 = arith.constant 0 : index
    %170 = vector.load %arg0[%c4, %c0_55, %c0_56] : memref<8x4x32xf32, #tpu.memory_space<vmem>>, vector<1x4x32xf32>
    %171 = vector.shape_cast %170 : vector<1x4x32xf32> to vector<4x32xf32>
    %c4_57 = arith.constant 4 : index
    %c0_58 = arith.constant 0 : index
    %c0_59 = arith.constant 0 : index
    %172 = vector.load %arg1[%c4_57, %c0_58, %c0_59] : memref<8x4x1xf32, #tpu.memory_space<vmem>>, vector<1x4x1xf32>
    %173 = vector.shape_cast %172 : vector<1x4x1xf32> to vector<4x1xf32>
    %cst_60 = arith.constant dense<0.000000e+00> : vector<4x96xf32>
    %174 = tpu.matmul %171, %0, %cst_60 {dimension_numbers = #tpu.dot_dimension_numbers<[1], [0], [0], [1], [0, 0, 1, 1], [], []>} : vector<4x32xf32>, vector<32x96xf32>, vector<4x96xf32> -> vector<4x96xf32>
    %175 = vector.broadcast %173 : vector<4x1xf32> to vector<4x96xf32>
    %176 = vector.broadcast %1 : vector<1x96xf32> to vector<4x96xf32>
    %177 = arith.mulf %175, %176 : vector<4x96xf32>
    %178 = arith.addf %174, %177 : vector<4x96xf32>
    %179 = vector.broadcast %3 : vector<1x96xf32> to vector<4x96xf32>
    %180 = arith.addf %178, %179 : vector<4x96xf32>
    %cst_61 = arith.constant dense<0.000000e+00> : vector<4x96xf32>
    %181 = tpu.matmul %168, %2, %cst_61 {dimension_numbers = #tpu.dot_dimension_numbers<[1], [0], [0], [1], [0, 0, 1, 1], [], []>} : vector<4x32xf32>, vector<32x96xf32>, vector<4x96xf32> -> vector<4x96xf32>
    %182 = vector.extract_strided_slice %180 {offsets = [0, 0], sizes = [4, 32], strides = [1, 1]} : vector<4x96xf32> to vector<4x32xf32>
    %183 = vector.extract_strided_slice %181 {offsets = [0, 0], sizes = [4, 32], strides = [1, 1]} : vector<4x96xf32> to vector<4x32xf32>
    %184 = arith.addf %182, %183 : vector<4x32xf32>
    %185 = arith.negf %184 : vector<4x32xf32>
    %186 = math.exp %185 : vector<4x32xf32>
    %cst_62 = arith.constant 1.000000e+00 : f32
    %187 = vector.broadcast %cst_62 : f32 to vector<4x32xf32>
    %188 = arith.addf %187, %186 : vector<4x32xf32>
    %189 = arith.divf %187, %188 : vector<4x32xf32>
    %190 = vector.extract_strided_slice %180 {offsets = [0, 32], sizes = [4, 32], strides = [1, 1]} : vector<4x96xf32> to vector<4x32xf32>
    %191 = vector.extract_strided_slice %181 {offsets = [0, 32], sizes = [4, 32], strides = [1, 1]} : vector<4x96xf32> to vector<4x32xf32>
    %192 = arith.addf %190, %191 : vector<4x32xf32>
    %193 = arith.negf %192 : vector<4x32xf32>
    %194 = math.exp %193 : vector<4x32xf32>
    %cst_63 = arith.constant 1.000000e+00 : f32
    %195 = vector.broadcast %cst_63 : f32 to vector<4x32xf32>
    %196 = arith.addf %195, %194 : vector<4x32xf32>
    %197 = arith.divf %195, %196 : vector<4x32xf32>
    %198 = vector.extract_strided_slice %180 {offsets = [0, 64], sizes = [4, 32], strides = [1, 1]} : vector<4x96xf32> to vector<4x32xf32>
    %199 = vector.extract_strided_slice %181 {offsets = [0, 64], sizes = [4, 32], strides = [1, 1]} : vector<4x96xf32> to vector<4x32xf32>
    %200 = vector.broadcast %4 : vector<1x32xf32> to vector<4x32xf32>
    %201 = arith.addf %199, %200 : vector<4x32xf32>
    %202 = arith.mulf %189, %201 : vector<4x32xf32>
    %203 = arith.addf %198, %202 : vector<4x32xf32>
    %204 = math.tanh %203 : vector<4x32xf32>
    %cst_64 = arith.constant 1.000000e+00 : f32
    %205 = vector.broadcast %cst_64 : f32 to vector<4x32xf32>
    %206 = arith.subf %205, %197 : vector<4x32xf32>
    %207 = arith.mulf %206, %204 : vector<4x32xf32>
    %208 = arith.mulf %197, %168 : vector<4x32xf32>
    %209 = arith.addf %207, %208 : vector<4x32xf32>
    %c0_65 = arith.constant 0 : index
    %c128 = arith.constant 128 : index
    %210 = vector.load %arg7[%c0_65, %c128] : memref<4x256xf32, #tpu.memory_space<vmem>>, vector<4x32xf32>
    tpu.vector_store %arg7[%c0_65, %c128], %209 {strides = array<i32>} : memref<4x256xf32, #tpu.memory_space<vmem>>, vector<4x32xf32>,
    %c5 = arith.constant 5 : index
    %c0_66 = arith.constant 0 : index
    %c0_67 = arith.constant 0 : index
    %211 = vector.load %arg0[%c5, %c0_66, %c0_67] : memref<8x4x32xf32, #tpu.memory_space<vmem>>, vector<1x4x32xf32>
    %212 = vector.shape_cast %211 : vector<1x4x32xf32> to vector<4x32xf32>
    %c5_68 = arith.constant 5 : index
    %c0_69 = arith.constant 0 : index
    %c0_70 = arith.constant 0 : index
    %213 = vector.load %arg1[%c5_68, %c0_69, %c0_70] : memref<8x4x1xf32, #tpu.memory_space<vmem>>, vector<1x4x1xf32>
    %214 = vector.shape_cast %213 : vector<1x4x1xf32> to vector<4x1xf32>
    %cst_71 = arith.constant dense<0.000000e+00> : vector<4x96xf32>
    %215 = tpu.matmul %212, %0, %cst_71 {dimension_numbers = #tpu.dot_dimension_numbers<[1], [0], [0], [1], [0, 0, 1, 1], [], []>} : vector<4x32xf32>, vector<32x96xf32>, vector<4x96xf32> -> vector<4x96xf32>
    %216 = vector.broadcast %214 : vector<4x1xf32> to vector<4x96xf32>
    %217 = vector.broadcast %1 : vector<1x96xf32> to vector<4x96xf32>
    %218 = arith.mulf %216, %217 : vector<4x96xf32>
    %219 = arith.addf %215, %218 : vector<4x96xf32>
    %220 = vector.broadcast %3 : vector<1x96xf32> to vector<4x96xf32>
    %221 = arith.addf %219, %220 : vector<4x96xf32>
    %cst_72 = arith.constant dense<0.000000e+00> : vector<4x96xf32>
    %222 = tpu.matmul %209, %2, %cst_72 {dimension_numbers = #tpu.dot_dimension_numbers<[1], [0], [0], [1], [0, 0, 1, 1], [], []>} : vector<4x32xf32>, vector<32x96xf32>, vector<4x96xf32> -> vector<4x96xf32>
    %223 = vector.extract_strided_slice %221 {offsets = [0, 0], sizes = [4, 32], strides = [1, 1]} : vector<4x96xf32> to vector<4x32xf32>
    %224 = vector.extract_strided_slice %222 {offsets = [0, 0], sizes = [4, 32], strides = [1, 1]} : vector<4x96xf32> to vector<4x32xf32>
    %225 = arith.addf %223, %224 : vector<4x32xf32>
    %226 = arith.negf %225 : vector<4x32xf32>
    %227 = math.exp %226 : vector<4x32xf32>
    %cst_73 = arith.constant 1.000000e+00 : f32
    %228 = vector.broadcast %cst_73 : f32 to vector<4x32xf32>
    %229 = arith.addf %228, %227 : vector<4x32xf32>
    %230 = arith.divf %228, %229 : vector<4x32xf32>
    %231 = vector.extract_strided_slice %221 {offsets = [0, 32], sizes = [4, 32], strides = [1, 1]} : vector<4x96xf32> to vector<4x32xf32>
    %232 = vector.extract_strided_slice %222 {offsets = [0, 32], sizes = [4, 32], strides = [1, 1]} : vector<4x96xf32> to vector<4x32xf32>
    %233 = arith.addf %231, %232 : vector<4x32xf32>
    %234 = arith.negf %233 : vector<4x32xf32>
    %235 = math.exp %234 : vector<4x32xf32>
    %cst_74 = arith.constant 1.000000e+00 : f32
    %236 = vector.broadcast %cst_74 : f32 to vector<4x32xf32>
    %237 = arith.addf %236, %235 : vector<4x32xf32>
    %238 = arith.divf %236, %237 : vector<4x32xf32>
    %239 = vector.extract_strided_slice %221 {offsets = [0, 64], sizes = [4, 32], strides = [1, 1]} : vector<4x96xf32> to vector<4x32xf32>
    %240 = vector.extract_strided_slice %222 {offsets = [0, 64], sizes = [4, 32], strides = [1, 1]} : vector<4x96xf32> to vector<4x32xf32>
    %241 = vector.broadcast %4 : vector<1x32xf32> to vector<4x32xf32>
    %242 = arith.addf %240, %241 : vector<4x32xf32>
    %243 = arith.mulf %230, %242 : vector<4x32xf32>
    %244 = arith.addf %239, %243 : vector<4x32xf32>
    %245 = math.tanh %244 : vector<4x32xf32>
    %cst_75 = arith.constant 1.000000e+00 : f32
    %246 = vector.broadcast %cst_75 : f32 to vector<4x32xf32>
    %247 = arith.subf %246, %238 : vector<4x32xf32>
    %248 = arith.mulf %247, %245 : vector<4x32xf32>
    %249 = arith.mulf %238, %209 : vector<4x32xf32>
    %250 = arith.addf %248, %249 : vector<4x32xf32>
    %c0_76 = arith.constant 0 : index
    %c160 = arith.constant 160 : index
    %251 = vector.load %arg7[%c0_76, %c160] : memref<4x256xf32, #tpu.memory_space<vmem>>, vector<4x32xf32>
    tpu.vector_store %arg7[%c0_76, %c160], %250 {strides = array<i32>} : memref<4x256xf32, #tpu.memory_space<vmem>>, vector<4x32xf32>,
    %c6 = arith.constant 6 : index
    %c0_77 = arith.constant 0 : index
    %c0_78 = arith.constant 0 : index
    %252 = vector.load %arg0[%c6, %c0_77, %c0_78] : memref<8x4x32xf32, #tpu.memory_space<vmem>>, vector<1x4x32xf32>
    %253 = vector.shape_cast %252 : vector<1x4x32xf32> to vector<4x32xf32>
    %c6_79 = arith.constant 6 : index
    %c0_80 = arith.constant 0 : index
    %c0_81 = arith.constant 0 : index
    %254 = vector.load %arg1[%c6_79, %c0_80, %c0_81] : memref<8x4x1xf32, #tpu.memory_space<vmem>>, vector<1x4x1xf32>
    %255 = vector.shape_cast %254 : vector<1x4x1xf32> to vector<4x1xf32>
    %cst_82 = arith.constant dense<0.000000e+00> : vector<4x96xf32>
    %256 = tpu.matmul %253, %0, %cst_82 {dimension_numbers = #tpu.dot_dimension_numbers<[1], [0], [0], [1], [0, 0, 1, 1], [], []>} : vector<4x32xf32>, vector<32x96xf32>, vector<4x96xf32> -> vector<4x96xf32>
    %257 = vector.broadcast %255 : vector<4x1xf32> to vector<4x96xf32>
    %258 = vector.broadcast %1 : vector<1x96xf32> to vector<4x96xf32>
    %259 = arith.mulf %257, %258 : vector<4x96xf32>
    %260 = arith.addf %256, %259 : vector<4x96xf32>
    %261 = vector.broadcast %3 : vector<1x96xf32> to vector<4x96xf32>
    %262 = arith.addf %260, %261 : vector<4x96xf32>
    %cst_83 = arith.constant dense<0.000000e+00> : vector<4x96xf32>
    %263 = tpu.matmul %250, %2, %cst_83 {dimension_numbers = #tpu.dot_dimension_numbers<[1], [0], [0], [1], [0, 0, 1, 1], [], []>} : vector<4x32xf32>, vector<32x96xf32>, vector<4x96xf32> -> vector<4x96xf32>
    %264 = vector.extract_strided_slice %262 {offsets = [0, 0], sizes = [4, 32], strides = [1, 1]} : vector<4x96xf32> to vector<4x32xf32>
    %265 = vector.extract_strided_slice %263 {offsets = [0, 0], sizes = [4, 32], strides = [1, 1]} : vector<4x96xf32> to vector<4x32xf32>
    %266 = arith.addf %264, %265 : vector<4x32xf32>
    %267 = arith.negf %266 : vector<4x32xf32>
    %268 = math.exp %267 : vector<4x32xf32>
    %cst_84 = arith.constant 1.000000e+00 : f32
    %269 = vector.broadcast %cst_84 : f32 to vector<4x32xf32>
    %270 = arith.addf %269, %268 : vector<4x32xf32>
    %271 = arith.divf %269, %270 : vector<4x32xf32>
    %272 = vector.extract_strided_slice %262 {offsets = [0, 32], sizes = [4, 32], strides = [1, 1]} : vector<4x96xf32> to vector<4x32xf32>
    %273 = vector.extract_strided_slice %263 {offsets = [0, 32], sizes = [4, 32], strides = [1, 1]} : vector<4x96xf32> to vector<4x32xf32>
    %274 = arith.addf %272, %273 : vector<4x32xf32>
    %275 = arith.negf %274 : vector<4x32xf32>
    %276 = math.exp %275 : vector<4x32xf32>
    %cst_85 = arith.constant 1.000000e+00 : f32
    %277 = vector.broadcast %cst_85 : f32 to vector<4x32xf32>
    %278 = arith.addf %277, %276 : vector<4x32xf32>
    %279 = arith.divf %277, %278 : vector<4x32xf32>
    %280 = vector.extract_strided_slice %262 {offsets = [0, 64], sizes = [4, 32], strides = [1, 1]} : vector<4x96xf32> to vector<4x32xf32>
    %281 = vector.extract_strided_slice %263 {offsets = [0, 64], sizes = [4, 32], strides = [1, 1]} : vector<4x96xf32> to vector<4x32xf32>
    %282 = vector.broadcast %4 : vector<1x32xf32> to vector<4x32xf32>
    %283 = arith.addf %281, %282 : vector<4x32xf32>
    %284 = arith.mulf %271, %283 : vector<4x32xf32>
    %285 = arith.addf %280, %284 : vector<4x32xf32>
    %286 = math.tanh %285 : vector<4x32xf32>
    %cst_86 = arith.constant 1.000000e+00 : f32
    %287 = vector.broadcast %cst_86 : f32 to vector<4x32xf32>
    %288 = arith.subf %287, %279 : vector<4x32xf32>
    %289 = arith.mulf %288, %286 : vector<4x32xf32>
    %290 = arith.mulf %279, %250 : vector<4x32xf32>
    %291 = arith.addf %289, %290 : vector<4x32xf32>
    %c0_87 = arith.constant 0 : index
    %c192 = arith.constant 192 : index
    %292 = vector.load %arg7[%c0_87, %c192] : memref<4x256xf32, #tpu.memory_space<vmem>>, vector<4x32xf32>
    tpu.vector_store %arg7[%c0_87, %c192], %291 {strides = array<i32>} : memref<4x256xf32, #tpu.memory_space<vmem>>, vector<4x32xf32>,
    %c7 = arith.constant 7 : index
    %c0_88 = arith.constant 0 : index
    %c0_89 = arith.constant 0 : index
    %293 = vector.load %arg0[%c7, %c0_88, %c0_89] : memref<8x4x32xf32, #tpu.memory_space<vmem>>, vector<1x4x32xf32>
    %294 = vector.shape_cast %293 : vector<1x4x32xf32> to vector<4x32xf32>
    %c7_90 = arith.constant 7 : index
    %c0_91 = arith.constant 0 : index
    %c0_92 = arith.constant 0 : index
    %295 = vector.load %arg1[%c7_90, %c0_91, %c0_92] : memref<8x4x1xf32, #tpu.memory_space<vmem>>, vector<1x4x1xf32>
    %296 = vector.shape_cast %295 : vector<1x4x1xf32> to vector<4x1xf32>
    %cst_93 = arith.constant dense<0.000000e+00> : vector<4x96xf32>
    %297 = tpu.matmul %294, %0, %cst_93 {dimension_numbers = #tpu.dot_dimension_numbers<[1], [0], [0], [1], [0, 0, 1, 1], [], []>} : vector<4x32xf32>, vector<32x96xf32>, vector<4x96xf32> -> vector<4x96xf32>
    %298 = vector.broadcast %296 : vector<4x1xf32> to vector<4x96xf32>
    %299 = vector.broadcast %1 : vector<1x96xf32> to vector<4x96xf32>
    %300 = arith.mulf %298, %299 : vector<4x96xf32>
    %301 = arith.addf %297, %300 : vector<4x96xf32>
    %302 = vector.broadcast %3 : vector<1x96xf32> to vector<4x96xf32>
    %303 = arith.addf %301, %302 : vector<4x96xf32>
    %cst_94 = arith.constant dense<0.000000e+00> : vector<4x96xf32>
    %304 = tpu.matmul %291, %2, %cst_94 {dimension_numbers = #tpu.dot_dimension_numbers<[1], [0], [0], [1], [0, 0, 1, 1], [], []>} : vector<4x32xf32>, vector<32x96xf32>, vector<4x96xf32> -> vector<4x96xf32>
    %305 = vector.extract_strided_slice %303 {offsets = [0, 0], sizes = [4, 32], strides = [1, 1]} : vector<4x96xf32> to vector<4x32xf32>
    %306 = vector.extract_strided_slice %304 {offsets = [0, 0], sizes = [4, 32], strides = [1, 1]} : vector<4x96xf32> to vector<4x32xf32>
    %307 = arith.addf %305, %306 : vector<4x32xf32>
    %308 = arith.negf %307 : vector<4x32xf32>
    %309 = math.exp %308 : vector<4x32xf32>
    %cst_95 = arith.constant 1.000000e+00 : f32
    %310 = vector.broadcast %cst_95 : f32 to vector<4x32xf32>
    %311 = arith.addf %310, %309 : vector<4x32xf32>
    %312 = arith.divf %310, %311 : vector<4x32xf32>
    %313 = vector.extract_strided_slice %303 {offsets = [0, 32], sizes = [4, 32], strides = [1, 1]} : vector<4x96xf32> to vector<4x32xf32>
    %314 = vector.extract_strided_slice %304 {offsets = [0, 32], sizes = [4, 32], strides = [1, 1]} : vector<4x96xf32> to vector<4x32xf32>
    %315 = arith.addf %313, %314 : vector<4x32xf32>
    %316 = arith.negf %315 : vector<4x32xf32>
    %317 = math.exp %316 : vector<4x32xf32>
    %cst_96 = arith.constant 1.000000e+00 : f32
    %318 = vector.broadcast %cst_96 : f32 to vector<4x32xf32>
    %319 = arith.addf %318, %317 : vector<4x32xf32>
    %320 = arith.divf %318, %319 : vector<4x32xf32>
    %321 = vector.extract_strided_slice %303 {offsets = [0, 64], sizes = [4, 32], strides = [1, 1]} : vector<4x96xf32> to vector<4x32xf32>
    %322 = vector.extract_strided_slice %304 {offsets = [0, 64], sizes = [4, 32], strides = [1, 1]} : vector<4x96xf32> to vector<4x32xf32>
    %323 = vector.broadcast %4 : vector<1x32xf32> to vector<4x32xf32>
    %324 = arith.addf %322, %323 : vector<4x32xf32>
    %325 = arith.mulf %312, %324 : vector<4x32xf32>
    %326 = arith.addf %321, %325 : vector<4x32xf32>
    %327 = math.tanh %326 : vector<4x32xf32>
    %cst_97 = arith.constant 1.000000e+00 : f32
    %328 = vector.broadcast %cst_97 : f32 to vector<4x32xf32>
    %329 = arith.subf %328, %320 : vector<4x32xf32>
    %330 = arith.mulf %329, %327 : vector<4x32xf32>
    %331 = arith.mulf %320, %291 : vector<4x32xf32>
    %332 = arith.addf %330, %331 : vector<4x32xf32>
    %c0_98 = arith.constant 0 : index
    %c224 = arith.constant 224 : index
    %333 = vector.load %arg7[%c0_98, %c224] : memref<4x256xf32, #tpu.memory_space<vmem>>, vector<4x32xf32>
    tpu.vector_store %arg7[%c0_98, %c224], %332 {strides = array<i32>} : memref<4x256xf32, #tpu.memory_space<vmem>>, vector<4x32xf32>,
    return
  }
}

</mosaic_0001>

<bundles_post_ra>
// kernel: encoder_forward.1
= control target key start
LH: loop header
LB: loop body
LE: loop exit
PB: predicated region body
PF: predicated region fallthrough
CT: control target
= control target key end

     0   :  { %v2022_v0 = vmov 0.0|0.0   ;;  %vm2023_vm0 = vmmov 0   ;;  %v2024_v8 = vmov 0.0   ;;  %v2025_v12 = vmov 0   ;;  %s2374_s2 = inlined_call_operand.vmem [shape: f32[32,96], index: 2, kind: input, shape index: {}]   ;;  %s2375_s4 = inlined_call_operand.vmem [shape: f32[32,96], index: 4, kind: input, shape index: {}]   ;;  %s2376_s6 = inlined_call_operand.vmem [shape: f32[1,32], index: 6, kind: input, shape index: {}]   ;;  %s2377_s1 = inlined_call_operand.vmem [shape: f32[8,4,1], index: 1, kind: input, shape index: {}]   ;;  %s2378_s0 = inlined_call_operand.vmem [shape: f32[8,4,32], index: 0, kind: input, shape index: {}]   ;;  %s2379_s3 = inlined_call_operand.vmem [shape: f32[1,96], index: 3, kind: input, shape index: {}]   ;;  %s2380_s5 = inlined_call_operand.vmem [shape: f32[1,96], index: 5, kind: input, shape index: {}]   ;;  %s2381_s7 = inlined_call_operand.vmem [shape: f32[4,256], index: 7, kind: output, shape index: {}]  }
   0x1   :  { %1869 = vmatprep.subr.bf16.mxu0 %v2022_v0  ;;  %1875 = vmatprep.subr.bf16.mxu1 %v2022_v0  ;;  %v26_v1 = vld [vmem:[%s2374_s2] sm:$0xff]  ;;  %v27_v2 = vld [vmem:[%s2374_s2 + $0x8] sm:$0xff]  ;;  %v28_v6 = vld [vmem:[%s2374_s2 + $0x10] sm:$0xff]  ;;  %vm51_vm1 = vcmask 261120   ;;  %vm244_vm2 = vcmask 257024   ;;  %vm429_vm3 = vcmask 519424  }
   0x2   :  { %v31_v3 = vld [vmem:[%s2375_s4] sm:$0xff]  ;;  %v2080_v4 = vpack.c.bf16 %v27_v2, %v26_v1  ;;  %v32_v5 = vld [vmem:[%s2375_s4 + $0x8] sm:$0xff]  ;;  %v29_v7 = vld [vmem:[%s2374_s2 + $0x18] sm:$0xff]  ;;  %1701 = vmatprep.mubr.msk.f32.mxu0 %vm2023_vm0, %v2024_v8  ;;  %1712 = vmatprep.mubr.msk.f32.mxu1 %vm2023_vm0, %v2024_v8  ;;  %vm621_vm4 = vcmask 781824   ;;  %vm812_vm5 = vcmask 1044224  }
   0x3   :  { %v2095_v9 = vpack.c.bf16 %v32_v5, %v31_v3  ;;  %v33_v10 = vld [vmem:[%s2375_s4 + $0x10] sm:$0xff]  ;;  %v34_v11 = vld [vmem:[%s2375_s4 + $0x18] sm:$0xff]  ;;  %1972 = vset.pattern.permute.xlu0 %v2025_v12  ;;  %1973 = vset.pattern.permute.xlu1 %v2025_v12  ;;  %v2104_v13 = vpack.c.bf16 %v29_v7, %v28_v6  ;;  %v1577_v14 = vld [vmem:[%s2376_s6] ss:$0 sm:$0xff]  ;;  %s2026_s4 = smov 64  }
   0x4   :  { %1871 = vmatpush3.bf16.msra.mxu0 %v2080_v4  ;;  %v2111_v15 = vpack.c.bf16 %v34_v11, %v33_v10  ;;  %217 = vrot.lane.b32.xlu0 %v1577_v14, %s2026_s4  ;;  %v38_v16 = vld [vmem:[%s2377_s1] sm:$0xf]  ;;  %v1578_v39 = vld [vmem:[%s2378_s0 + $0x4] sm:$0xf]  ;;  %v1583_v50 = vld [vmem:[%s2378_s0 + $0x8] sm:$0xf] }
   0x5   :  { %1877 = vmatpush3.bf16.msra.mxu1 %v2095_v9  ;;  %1872 = vmatprep.subr.bf16.mxu0 %v2022_v0  ;;  %v37_v17 = vld [vmem:[%s2378_s0] sm:$0xf]  ;;  %v1579_v41 = vld [vmem:[%s2377_s1 + $0x4] sm:$0xf]  ;;  %v1584_v6 = vld [vmem:[%s2377_s1 + $0x8] sm:$0xf] }
   0x6   :  { %1878 = vmatprep.subr.bf16.mxu1 %v2022_v0  ;;  %v2146_v24 = vld [vmem:[%s2379_s3] ss:$0 sm:$0xff] }
   0x7   :  { %v2152_v28 = vld [vmem:[%s2380_s5] ss:$0 sm:$0xff]  ;;  %s2027_s5 = smov 96  }
   0x8   :  { %1874 = vmatpush3.bf16.msra.mxu0 %v2104_v13  ;;  %41 = vperm.xlu0 %1972, %v38_v16  }
   0x9   :  { %1880 = vmatpush3.bf16.msra.mxu1 %v2111_v15  ;;  %1881 = vmatprep.subr.bf16.mxu0 %v2022_v0 }
   0xa   :  { %1887 = vmatprep.subr.bf16.mxu1 %v2022_v0 }
   0xb   :  { %1702 = vmatmul.mubr.msk.f32.vlgmr.msra.gmra.mrb[0].mxu0 %vm51_vm1, %v37_v17 }
   0xc   :  { %1713 = vmatmul.mubr.f32.vlgmr.msra.gmra.mrb[0].mxu1 %v2024_v8  ;;  %1883 = vmatpush3.bf16.msra.mxu0 %v2080_v4 }
   0xd   :  { %1884 = vmatprep.subr.bf16.mxu0 %v2022_v0  ;;  %1889 = vmatpush3.bf16.msra.mxu1 %v2095_v9 }
   0xe   :  { %1723 = vmatprep.mubr.msk.f32.mxu0 %vm2023_vm0, %v2024_v8  ;;  %1890 = vmatprep.subr.bf16.mxu1 %v2022_v0 }
   0xf   :  { %1734 = vmatprep.mubr.msk.f32.mxu1 %vm2023_vm0, %v2024_v8 }
  0x10   :  { %1886 = vmatpush3.bf16.msra.mxu0 %v2104_v13 }
  0x11   :  { %1892 = vmatpush3.bf16.msra.mxu1 %v2111_v15  ;;  %1893 = vmatprep.subr.bf16.mxu0 %v2022_v0 }
  0x12   :  { %1899 = vmatprep.subr.bf16.mxu1 %v2022_v0 }
  0x13   :  { %1724 = vmatmul.mubr.msk.f32.vlgmr.msra.gmra.mrb[2].mxu0 %vm51_vm1, %v1578_v39 }
  0x14   :  { %1895 = vmatpush3.bf16.msra.mxu0 %v2080_v4  ;;  %1745 = vmatprep.mubr.msk.f32.mxu0 %vm2023_vm0, %v2024_v8 }
  0x15   :  { %1896 = vmatprep.subr.bf16.mxu0 %v2022_v0 }
  0x18   :  { %1898 = vmatpush3.bf16.msra.mxu0 %v2104_v13 }
  0x19   :  { %1905 = vmatprep.subr.bf16.mxu0 %v2022_v0 }
  0x1b   :  { %1746 = vmatmul.mubr.msk.f32.vlgmr.msra.gmra.mrb[4].mxu0 %vm51_vm1, %v1583_v50 }
  0x1c   :  { %1907 = vmatpush3.bf16.msra.mxu0 %v2080_v4  ;;  %1767 = vmatprep.mubr.msk.f32.mxu0 %vm2023_vm0, %v2024_v8 }
  0x1d   :  { %1908 = vmatprep.subr.bf16.mxu0 %v2022_v0 }
  0x20   :  { %1910 = vmatpush3.bf16.msra.mxu0 %v2104_v13 }
  0x21   :  { %1917 = vmatprep.subr.bf16.mxu0 %v2022_v0 }
  0x76   :  { %v2139_v18 = vpop.permute.xlu0 %217 }
  0x87   :  { %v42_v25 = vpop.permute.xlu0 %41 }
  0x88   :  { %v50_v26 = vmul.f32 %v2146_v24, %v42_v25 }
  0xde   :  { %v121_v19 = vpop.f32.mrb[0].mxu0 }
  0xdf   :  { %v201_v20 = vpop.f32.mrb[0].mxu1  ;;  %v1703_v21 = vpop.f32.mrb[1].mxu0  ;;  %v122_v27 = vadd.f32 %v121_v19, %v50_v26 }
  0xe0   :  { %v1714_v22 = vpop.f32.mrb[1].mxu1  ;;  %v220_v23 = vadd.f32 %v2139_v18, %v201_v20 }
  0xe1   :  { %v131_v29 = vadd.f32 %v2152_v28, %v122_v27 }
  0xe2   :  { %222 = vrot.lane.b32.xlu1 %v220_v23, %s2026_s4 }
  0xe3   :  { %v205_v30 = vadd.f32 %v201_v20, %v131_v29  ;;  %v1588_v20 = vld [vmem:[%s2378_s0 + $0xc] sm:$0xf] }
  0xe4   :  { %1768 = vmatmul.mubr.msk.f32.vlgmr.msra.gmra.mrb[6].mxu0 %vm51_vm1, %v1588_v20 }
  0xe5   :  { %v1576_v31 = vmul.f32 -1.442695, %v205_v30  ;;  %1919 = vmatpush3.bf16.msra.mxu0 %v2080_v4  ;;  %1789 = vmatprep.mubr.msk.f32.mxu0 %vm2023_vm0, %v2024_v8 }
  0xe6   :  { %v325_v47 = vpop.f32.mrb[2].mxu0  ;;  %1920 = vmatprep.subr.bf16.mxu0 %v2022_v0 }
  0xe7   :  { %1974 = vpow2.f32 %v1576_v31  ;;  %v1725_v48 = vpop.f32.mrb[3].mxu0 }
  0xe9   :  { %1922 = vmatpush3.bf16.msra.mxu0 %v2104_v13 }
  0xea   :  { %1929 = vmatprep.subr.bf16.mxu0 %v2022_v0 }
  0xee   :  { %v510_v7 = vpop.f32.mrb[4].mxu0 }
  0xef   :  { %v1747_v10 = vpop.f32.mrb[5].mxu0 }
  0xf1   :  { %v1975_v32 = vpop.eup %1974 }
  0xf2   :  { %v209_v33 = vadd.f32 1.0, %v1975_v32 }
  0xf4   :  { %1976 = vrcp.f32 %v209_v33 }
  0xfe   :  { %v1977_v34 = vpop.eup %1976 }
  0xff   :  { %v232_v42 = vsub.f32 1.0, %v1977_v34  ;;  %v238_v44 = vmul.f32 0.0, %v1977_v34 }
 0x154   :  { %v223_v35 = vpop.permute.xlu1 %222 }
 0x155   :  { %v225_v36 = vmul.f32 %v1977_v34, %v223_v35 }
 0x157   :  { %227 = vrot.lane.b32.xlu1 %v225_v36, %s2026_s4 }
 0x1c9   :  { %v228_v37 = vpop.permute.xlu1 %227 }
 0x1ca   :  { %v230_v38 = vadd.f32 %v228_v37, %v131_v29 }
 0x1cc   :  { %1978 = vtanh.f32 %v230_v38 }
 0x1d6   :  { %v1979_v40 = vpop.eup %1978 }
 0x1d7   :  { %234 = vrot.lane.b32.xlu1 %v1979_v40, %s2027_s5  ;;  %v1589_v40 = vld [vmem:[%s2377_s1 + $0xc] sm:$0xf] }
 0x1db   :  { %252 = vperm.xlu1 %1973, %v1579_v41   ;;  %v702_v41 = vpop.f32.mrb[6].mxu0 }
 0x249   :  { %v235_v43 = vpop.permute.xlu1 %234 }
 0x24a   :  { %v237_v45 = vmul.f32 %v235_v43, %v232_v42  ;;  %v1769_v42 = vpop.f32.mrb[7].mxu0 }
 0x24c   :  { %v239_v46 = vadd.f32 %v238_v44, %v237_v45 }
 0x24e   :  { %241 = vrot.lane.b32.xlu0 %v239_v46, %s2027_s5 }
 0x25a   :  { %v253_v54 = vpop.permute.xlu1 %252 }
 0x25b   :  { %v255_v55 = vmul.f32 %v2146_v24, %v253_v54 }
 0x25d   :  { %v326_v56 = vadd.f32 %v325_v47, %v255_v55 }
 0x25f   :  { %v329_v57 = vadd.f32 %v2152_v28, %v326_v56 }
 0x2c0   :  { %v242_v49 = vpop.permute.xlu0 %241 }
 0x2c1   :  { %245 = vst.msk [vmem:[%s2381_s7] sm:$0xf] %vm244_vm2, %v242_v49  ;;  %1735 = vmatmul.mubr.msk.f32.vlgmr.msra.gmra.mrb[2].mxu1 %vm51_vm1, %v242_v49  ;;  %v1593_v49 = vld [vmem:[%s2378_s0 + $0x10] sm:$0xf] }
 0x2c2   :  { %1901 = vmatpush3.bf16.msra.mxu1 %v2095_v9  ;;  %1756 = vmatprep.mubr.msk.f32.mxu1 %vm2023_vm0, %v2024_v8 }
 0x2c3   :  { %1902 = vmatprep.subr.bf16.mxu1 %v2022_v0  ;;  %1790 = vmatmul.mubr.msk.f32.vlgmr.msra.gmra.mrb[8].mxu0 %vm51_vm1, %v1593_v49  ;;  %v1603_v49 = vld [vmem:[%s2378_s0 + $0x18] sm:$0xf] }
 0x2c4   :  { %1931 = vmatpush3.bf16.msra.mxu0 %v2080_v4  ;;  %1811 = vmatprep.mubr.msk.f32.mxu0 %vm2023_vm0, %v2024_v8 }
 0x2c5   :  { %1932 = vmatprep.subr.bf16.mxu0 %v2022_v0 }
 0x2c6   :  { %1904 = vmatpush3.bf16.msra.mxu1 %v2111_v15 }
 0x2c7   :  { %1911 = vmatprep.subr.bf16.mxu1 %v2022_v0 }
 0x2c8   :  { %1934 = vmatpush3.bf16.msra.mxu0 %v2104_v13 }
 0x2c9   :  { %1941 = vmatprep.subr.bf16.mxu0 %v2022_v0 }
 0x394   :  { %v398_v51 = vpop.f32.mrb[2].mxu1 }
 0x395   :  { %v409_v52 = vadd.f32 %v398_v51, %v2139_v18  ;;  %v1736_v53 = vpop.f32.mrb[3].mxu1  ;;  %v402_v58 = vadd.f32 %v398_v51, %v329_v57 }
 0x397   :  { %411 = vrot.lane.b32.xlu0 %v409_v52, %s2026_s4  ;;  %v1582_v59 = vmul.f32 -1.442695, %v402_v58 }
 0x399   :  { %1980 = vpow2.f32 %v1582_v59 }
 0x3a3   :  { %v1981_v60 = vpop.eup %1980 }
 0x3a4   :  { %v406_v61 = vadd.f32 1.0, %v1981_v60 }
 0x3a6   :  { %1982 = vrcp.f32 %v406_v61 }
 0x3b0   :  { %v1983_v62 = vpop.eup %1982 }
 0x3b1   :  { %v421_v11 = vsub.f32 1.0, %v1983_v62  ;;  %v427_v14 = vmul.f32 %v1983_v62, %v239_v46 }
 0x409   :  { %v412_v63 = vpop.permute.xlu0 %411 }
 0x40a   :  { %v414_v1 = vmul.f32 %v1983_v62, %v412_v63 }
 0x40c   :  { %416 = vrot.lane.b32.xlu1 %v414_v1, %s2026_s4 }
 0x47e   :  { %v417_v2 = vpop.permute.xlu1 %416 }
 0x47f   :  { %v419_v3 = vadd.f32 %v417_v2, %v329_v57 }
 0x481   :  { %1984 = vtanh.f32 %v419_v3 }
 0x48b   :  { %v1985_v5 = vpop.eup %1984 }
 0x48c   :  { %423 = vrot.lane.b32.xlu0 %v1985_v5, %s2027_s5  ;;  %v1594_v5 = vld [vmem:[%s2377_s1 + $0x10] sm:$0xf] }
 0x490   :  { %437 = vperm.xlu0 %1972, %v1584_v6   ;;  %v893_v6 = vpop.f32.mrb[8].mxu0 }
 0x4fe   :  { %v424_v12 = vpop.permute.xlu0 %423 }
 0x4ff   :  { %v426_v16 = vmul.f32 %v424_v12, %v421_v11 }
 0x501   :  { %v428_v17 = vadd.f32 %v427_v14, %v426_v16 }
 0x503   :  { %516 = vrot.lane.b32.xlu1 %v428_v17, %s2027_s5  ;;  %430 = vst.msk [vmem:[%s2381_s7] sm:$0xf] %vm429_vm3, %v428_v17 }
 0x50f   :  { %v438_v25 = vpop.permute.xlu0 %437 }
 0x510   :  { %v440_v26 = vmul.f32 %v2146_v24, %v438_v25 }
 0x512   :  { %v511_v27 = vadd.f32 %v510_v7, %v440_v26  ;;  %v1791_v7 = vpop.f32.mrb[9].mxu0 }
 0x514   :  { %v514_v29 = vadd.f32 %v2152_v28, %v511_v27 }
 0x575   :  { %v517_v19 = vpop.permute.xlu1 %516 }
 0x576   :  { %1757 = vmatmul.mubr.msk.f32.vlgmr.msra.gmra.mrb[4].mxu1 %vm51_vm1, %v517_v19  ;;  %v1598_v19 = vld [vmem:[%s2378_s0 + $0x14] sm:$0xf] }
 0x577   :  { %1913 = vmatpush3.bf16.msra.mxu1 %v2095_v9  ;;  %1778 = vmatprep.mubr.msk.f32.mxu1 %vm2023_vm0, %v2024_v8 }
 0x578   :  { %1914 = vmatprep.subr.bf16.mxu1 %v2022_v0  ;;  %1812 = vmatmul.mubr.msk.f32.vlgmr.msra.gmra.mrb[10].mxu0 %vm51_vm1, %v1598_v19 }
 0x579   :  { %1943 = vmatpush3.bf16.msra.mxu0 %v2080_v4  ;;  %1833 = vmatprep.mubr.msk.f32.mxu0 %vm2023_vm0, %v2024_v8 }
 0x57a   :  { %1944 = vmatprep.subr.bf16.mxu0 %v2022_v0 }
 0x57b   :  { %1916 = vmatpush3.bf16.msra.mxu1 %v2111_v15 }
 0x57c   :  { %1923 = vmatprep.subr.bf16.mxu1 %v2022_v0 }
 0x57d   :  { %1946 = vmatpush3.bf16.msra.mxu0 %v2104_v13 }
 0x57e   :  { %1953 = vmatprep.subr.bf16.mxu0 %v2022_v0 }
 0x580   :  { %1834 = vmatmul.mubr.msk.f32.vlgmr.msra.gmra.mrb[12].mxu0 %vm51_vm1, %v1603_v49 }
 0x581   :  { %1955 = vmatpush3.bf16.msra.mxu0 %v2080_v4  ;;  %1855 = vmatprep.mubr.msk.f32.mxu0 %vm2023_vm0, %v2024_v8 }
 0x582   :  { %1956 = vmatprep.subr.bf16.mxu0 %v2022_v0 }
 0x585   :  { %1958 = vmatpush3.bf16.msra.mxu0 %v2104_v13 }
 0x649   :  { %v586_v21 = vpop.f32.mrb[4].mxu1 }
 0x64a   :  { %v597_v22 = vadd.f32 %v586_v21, %v2139_v18  ;;  %v1758_v23 = vpop.f32.mrb[5].mxu1  ;;  %v590_v30 = vadd.f32 %v586_v21, %v514_v29 }
 0x64c   :  { %599 = vrot.lane.b32.xlu1 %v597_v22, %s2026_s4  ;;  %v1587_v31 = vmul.f32 -1.442695, %v590_v30 }
 0x64e   :  { %1986 = vpow2.f32 %v1587_v31 }
 0x658   :  { %v1987_v32 = vpop.eup %1986 }
 0x659   :  { %v594_v33 = vadd.f32 1.0, %v1987_v32 }
 0x65b   :  { %1988 = vrcp.f32 %v594_v33 }
 0x665   :  { %v1989_v34 = vpop.eup %1988 }
 0x666   :  { %v609_v43 = vsub.f32 1.0, %v1989_v34  ;;  %v615_v45 = vmul.f32 %v1989_v34, %v428_v17 }
 0x6be   :  { %v600_v35 = vpop.permute.xlu1 %599 }
 0x6bf   :  { %v602_v36 = vmul.f32 %v1989_v34, %v600_v35 }
 0x6c1   :  { %604 = vrot.lane.b32.xlu0 %v602_v36, %s2026_s4 }
 0x733   :  { %v605_v37 = vpop.permute.xlu0 %604 }
 0x734   :  { %v607_v38 = vadd.f32 %v605_v37, %v514_v29 }
 0x736   :  { %1990 = vtanh.f32 %v607_v38 }
 0x740   :  { %v1991_v39 = vpop.eup %1990 }
 0x741   :  { %611 = vrot.lane.b32.xlu1 %v1991_v39, %s2027_s5  ;;  %v1599_v39 = vld [vmem:[%s2377_s1 + $0x14] sm:$0xf] }
 0x745   :  { %629 = vperm.xlu1 %1973, %v1589_v40   ;;  %v1083_v40 = vpop.f32.mrb[10].mxu0 }
 0x7b3   :  { %v612_v44 = vpop.permute.xlu1 %611 }
 0x7b4   :  { %v614_v46 = vmul.f32 %v612_v44, %v609_v43 }
 0x7b6   :  { %v2232_v47 = vadd.f32 %v615_v45, %v614_v46 }
 0x7b8   :  { %707 = vrot.lane.b32.xlu0 %v2232_v47, %s2027_s5 }
 0x7c4   :  { %v630_v53 = vpop.permute.xlu1 %629 }
 0x7c5   :  { %v632_v54 = vmul.f32 %v2146_v24, %v630_v53 }
 0x7c7   :  { %v703_v55 = vadd.f32 %v702_v41, %v632_v54  ;;  %v1813_v41 = vpop.f32.mrb[11].mxu0 }
 0x7c9   :  { %v706_v56 = vadd.f32 %v2152_v28, %v703_v55 }
 0x82a   :  { %v708_v48 = vpop.permute.xlu0 %707 }
 0x82b   :  { %1779 = vmatmul.mubr.msk.f32.vlgmr.msra.gmra.mrb[6].mxu1 %vm51_vm1, %v708_v48 }
 0x82c   :  { %1925 = vmatpush3.bf16.msra.mxu1 %v2095_v9  ;;  %1800 = vmatprep.mubr.msk.f32.mxu1 %vm2023_vm0, %v2024_v8 }
 0x82d   :  { %1926 = vmatprep.subr.bf16.mxu1 %v2022_v0 }
 0x830   :  { %1928 = vmatpush3.bf16.msra.mxu1 %v2111_v15 }
 0x831   :  { %1935 = vmatprep.subr.bf16.mxu1 %v2022_v0 }
 0x8fe   :  { %v777_v50 = vpop.f32.mrb[6].mxu1 }
 0x8ff   :  { %v788_v51 = vadd.f32 %v777_v50, %v2139_v18  ;;  %v1780_v52 = vpop.f32.mrb[7].mxu1  ;;  %v781_v57 = vadd.f32 %v777_v50, %v706_v56 }
 0x901   :  { %790 = vrot.lane.b32.xlu0 %v788_v51, %s2026_s4  ;;  %v1592_v58 = vmul.f32 -1.442695, %v781_v57 }
 0x903   :  { %1992 = vpow2.f32 %v1592_v58 }
 0x90d   :  { %v1993_v59 = vpop.eup %1992 }
 0x90e   :  { %v785_v60 = vadd.f32 1.0, %v1993_v59 }
 0x910   :  { %1994 = vrcp.f32 %v785_v60 }
 0x91a   :  { %v1995_v61 = vpop.eup %1994 }
 0x91b   :  { %v800_v10 = vsub.f32 1.0, %v1995_v61  ;;  %v806_v12 = vmul.f32 %v1995_v61, %v2232_v47 }
 0x973   :  { %v791_v62 = vpop.permute.xlu0 %790 }
 0x974   :  { %v793_v63 = vmul.f32 %v1995_v61, %v791_v62 }
 0x976   :  { %795 = vrot.lane.b32.xlu1 %v793_v63, %s2026_s4 }
 0x9e8   :  { %v796_v1 = vpop.permute.xlu1 %795 }
 0x9e9   :  { %v798_v2 = vadd.f32 %v796_v1, %v706_v56 }
 0x9eb   :  { %1996 = vtanh.f32 %v798_v2  ;;  %v1604_v2 = vld [vmem:[%s2377_s1 + $0x18] sm:$0xf] }
 0x9f5   :  { %v1997_v3 = vpop.eup %1996 }
 0x9f6   :  { %802 = vrot.lane.b32.xlu0 %v1997_v3, %s2027_s5  ;;  %v1267_v3 = vpop.f32.mrb[12].mxu0 }
 0x9fa   :  { %820 = vperm.xlu0 %1972, %v1594_v5   ;;  %v1835_v5 = vpop.f32.mrb[13].mxu0 }
 0xa68   :  { %v803_v11 = vpop.permute.xlu0 %802 }
 0xa69   :  { %v805_v14 = vmul.f32 %v803_v11, %v800_v10 }
 0xa6b   :  { %v2263_v16 = vadd.f32 %v806_v12, %v805_v14 }
 0xa6d   :  { %898 = vrot.lane.b32.xlu1 %v2263_v16, %s2027_s5 }
 0xa79   :  { %v821_v23 = vpop.permute.xlu0 %820 }
 0xa7a   :  { %v823_v25 = vmul.f32 %v2146_v24, %v821_v23 }
 0xa7c   :  { %v894_v26 = vadd.f32 %v893_v6, %v823_v25 }
 0xa7e   :  { %v897_v27 = vadd.f32 %v2152_v28, %v894_v26 }
 0xadf   :  { %v899_v17 = vpop.permute.xlu1 %898 }
 0xae0   :  { %1801 = vmatmul.mubr.msk.f32.vlgmr.msra.gmra.mrb[8].mxu1 %vm51_vm1, %v899_v17  ;;  %v1608_v17 = vld [vmem:[%s2378_s0 + $0x1c] sm:$0xf] }
 0xae1   :  { %1937 = vmatpush3.bf16.msra.mxu1 %v2095_v9  ;;  %1822 = vmatprep.mubr.msk.f32.mxu1 %vm2023_vm0, %v2024_v8 }
 0xae2   :  { %1938 = vmatprep.subr.bf16.mxu1 %v2022_v0  ;;  %1856 = vmatmul.mubr.msk.f32.vlgmr.msra.gmra.mrb[14].mxu0 %vm51_vm1, %v1608_v17 }
 0xae5   :  { %1940 = vmatpush3.bf16.msra.mxu1 %v2111_v15 }
 0xae6   :  { %1947 = vmatprep.subr.bf16.mxu1 %v2022_v0 }
 0xbb3   :  { %v968_v20 = vpop.f32.mrb[8].mxu1 }
 0xbb4   :  { %v979_v21 = vadd.f32 %v968_v20, %v2139_v18  ;;  %v1802_v22 = vpop.f32.mrb[9].mxu1  ;;  %v972_v29 = vadd.f32 %v968_v20, %v897_v27 }
 0xbb6   :  { %981 = vrot.lane.b32.xlu1 %v979_v21, %s2026_s4  ;;  %v1597_v30 = vmul.f32 -1.442695, %v972_v29 }
 0xbb8   :  { %1998 = vpow2.f32 %v1597_v30 }
 0xbc2   :  { %v1999_v31 = vpop.eup %1998 }
 0xbc3   :  { %v976_v32 = vadd.f32 1.0, %v1999_v31 }
 0xbc5   :  { %2000 = vrcp.f32 %v976_v32 }
 0xbcf   :  { %v2001_v33 = vpop.eup %2000 }
 0xbd0   :  { %v991_v42 = vsub.f32 1.0, %v2001_v33  ;;  %v997_v44 = vmul.f32 %v2001_v33, %v2263_v16 }
 0xc28   :  { %v982_v34 = vpop.permute.xlu1 %981 }
 0xc29   :  { %v984_v35 = vmul.f32 %v2001_v33, %v982_v34  ;;  %v1609_v34 = vld [vmem:[%s2377_s1 + $0x1c] sm:$0xf]  ;;  %s2028_s1 = smov 32  }
 0xc2b   :  { %986 = vrot.lane.b32.xlu0 %v984_v35, %s2026_s4  ;;  %v1458_v35 = vpop.f32.mrb[14].mxu0 }
 0xc9d   :  { %v987_v36 = vpop.permute.xlu0 %986 }
 0xc9e   :  { %v989_v37 = vadd.f32 %v987_v36, %v897_v27  ;;  %v1857_v36 = vpop.f32.mrb[15].mxu0 }
 0xca0   :  { %2002 = vtanh.f32 %v989_v37 }
 0xcaa   :  { %v2003_v38 = vpop.eup %2002 }
 0xcab   :  { %993 = vrot.lane.b32.xlu1 %v2003_v38, %s2027_s5 }
 0xcaf   :  { %1010 = vperm.xlu1 %1973, %v1599_v39  }
 0xd1d   :  { %v994_v43 = vpop.permute.xlu1 %993 }
 0xd1e   :  { %v996_v45 = vmul.f32 %v994_v43, %v991_v42 }
 0xd20   :  { %v998_v46 = vadd.f32 %v997_v44, %v996_v45 }
 0xd22   :  { %1000 = vrot.lane.b32.xlu0 %v998_v46, %s2027_s5 }
 0xd2e   :  { %v1011_v53 = vpop.permute.xlu1 %1010 }
 0xd2f   :  { %v1013_v54 = vmul.f32 %v2146_v24, %v1011_v53 }
 0xd31   :  { %v1084_v55 = vadd.f32 %v1083_v40, %v1013_v54 }
 0xd33   :  { %v1087_v56 = vadd.f32 %v2152_v28, %v1084_v55 }
 0xd94   :  { %v1001_v48 = vpop.permute.xlu0 %1000 }
 0xd95   :  { %1003 = vst.msk [vmem:[%s2381_s7 + $0x4] sm:$0xf] %vm244_vm2, %v1001_v48  ;;  %1823 = vmatmul.mubr.msk.f32.vlgmr.msra.gmra.mrb[10].mxu1 %vm51_vm1, %v1001_v48 }
 0xd96   :  { %1949 = vmatpush3.bf16.msra.mxu1 %v2095_v9  ;;  %1844 = vmatprep.mubr.msk.f32.mxu1 %vm2023_vm0, %v2024_v8 }
 0xd97   :  { %1950 = vmatprep.subr.bf16.mxu1 %v2022_v0 }
 0xd9a   :  { %1952 = vmatpush3.bf16.msra.mxu1 %v2111_v15 }
 0xd9b   :  { %1959 = vmatprep.subr.bf16.mxu1 %v2022_v0 }
 0xe68   :  { %v1156_v50 = vpop.f32.mrb[10].mxu1 }
 0xe69   :  { %v1167_v51 = vadd.f32 %v1156_v50, %v2139_v18  ;;  %v1824_v52 = vpop.f32.mrb[11].mxu1  ;;  %v1160_v4 = vadd.f32 %v1156_v50, %v1087_v56 }
 0xe6b   :  { %1169 = vrot.lane.b32.xlu0 %v1167_v51, %s2026_s4  ;;  %v1602_v57 = vmul.f32 -1.442695, %v1160_v4 }
 0xe6d   :  { %2004 = vpow2.f32 %v1602_v57 }
 0xe77   :  { %v2005_v58 = vpop.eup %2004 }
 0xe78   :  { %v1164_v59 = vadd.f32 1.0, %v2005_v58 }
 0xe7a   :  { %2006 = vrcp.f32 %v1164_v59 }
 0xe84   :  { %v2007_v60 = vpop.eup %2006 }
 0xe85   :  { %v1179_v6 = vsub.f32 1.0, %v2007_v60  ;;  %v1185_v10 = vmul.f32 %v2007_v60, %v998_v46 }
 0xedd   :  { %v1170_v13 = vpop.permute.xlu0 %1169 }
 0xede   :  { %v1172_v61 = vmul.f32 %v2007_v60, %v1170_v13 }
 0xee0   :  { %1174 = vrot.lane.b32.xlu1 %v1172_v61, %s2026_s4 }
 0xf52   :  { %v1175_v62 = vpop.permute.xlu1 %1174 }
 0xf53   :  { %v1177_v63 = vadd.f32 %v1175_v62, %v1087_v56 }
 0xf55   :  { %2008 = vtanh.f32 %v1177_v63 }
 0xf5f   :  { %v2009_v1 = vpop.eup %2008 }
 0xf60   :  { %1181 = vrot.lane.b32.xlu0 %v2009_v1, %s2027_s5 }
 0xf64   :  { %1194 = vperm.xlu0 %1972, %v1604_v2  }
 0xfd2   :  { %v1182_v7 = vpop.permute.xlu0 %1181 }
 0xfd3   :  { %v1184_v11 = vmul.f32 %v1182_v7, %v1179_v6 }
 0xfd5   :  { %v1186_v12 = vadd.f32 %v1185_v10, %v1184_v11 }
 0xfd7   :  { %1273 = vrot.lane.b32.xlu1 %v1186_v12, %s2027_s5  ;;  %1187 = vst.msk [vmem:[%s2381_s7 + $0x4] sm:$0xf] %vm429_vm3, %v1186_v12 }
0x1049   :  { %v1274_v14 = vpop.permute.xlu1 %1273 }
0x104a   :  { %1845 = vmatmul.mubr.msk.f32.vlgmr.msra.gmra.mrb[12].mxu1 %vm51_vm1, %v1274_v14 }
0x104b   :  { %1961 = vmatpush3.bf16.msra.mxu1 %v2095_v9  ;;  %1866 = vmatprep.mubr.msk.f32.mxu1 %vm2023_vm0, %v2024_v8  ;;  %v1195_v9 = vpop.permute.xlu0 %1194 }
0x104c   :  { %1962 = vmatprep.subr.bf16.mxu1 %v2022_v0  ;;  %v1197_v22 = vmul.f32 %v2146_v24, %v1195_v9 }
0x104e   :  { %v1268_v8 = vadd.f32 %v1267_v3, %v1197_v22 }
0x104f   :  { %1964 = vmatpush3.bf16.msra.mxu1 %v2111_v15 }
0x1050   :  { %v1271_v0 = vadd.f32 %v2152_v28, %v1268_v8 }
0x111d   :  { %v1343_v19 = vpop.f32.mrb[12].mxu1 }
0x111e   :  { %v1354_v20 = vadd.f32 %v1343_v19, %v2139_v18  ;;  %v1846_v21 = vpop.f32.mrb[13].mxu1  ;;  %v1347_v23 = vadd.f32 %v1343_v19, %v1271_v0 }
0x1120   :  { %1356 = vrot.lane.b32.xlu1 %v1354_v20, %s2026_s4  ;;  %v1607_v15 = vmul.f32 -1.442695, %v1347_v23 }
0x1122   :  { %2010 = vpow2.f32 %v1607_v15 }
0x112c   :  { %v2011_v25 = vpop.eup %2010 }
0x112d   :  { %v1351_v26 = vadd.f32 1.0, %v2011_v25 }
0x112f   :  { %2012 = vrcp.f32 %v1351_v26 }
0x1139   :  { %v2013_v27 = vpop.eup %2012 }
0x113a   :  { %v1366_v37 = vsub.f32 1.0, %v2013_v27  ;;  %v1372_v39 = vmul.f32 %v2013_v27, %v1186_v12 }
0x1192   :  { %v1357_v29 = vpop.permute.xlu1 %1356 }
0x1193   :  { %v1359_v30 = vmul.f32 %v2013_v27, %v1357_v29 }
0x1195   :  { %1361 = vrot.lane.b32.xlu0 %v1359_v30, %s2026_s4 }
0x1207   :  { %v1362_v31 = vpop.permute.xlu0 %1361 }
0x1208   :  { %v1364_v32 = vadd.f32 %v1362_v31, %v1271_v0 }
0x120a   :  { %2014 = vtanh.f32 %v1364_v32 }
0x1214   :  { %v2015_v33 = vpop.eup %2014 }
0x1215   :  { %1368 = vrot.lane.b32.xlu1 %v2015_v33, %s2027_s5 }
0x1219   :  { %1385 = vperm.xlu1 %1973, %v1609_v34  }
0x1287   :  { %v1369_v38 = vpop.permute.xlu1 %1368 }
0x1288   :  { %v1371_v40 = vmul.f32 %v1369_v38, %v1366_v37 }
0x128a   :  { %v1373_v41 = vadd.f32 %v1372_v39, %v1371_v40 }
0x128c   :  { %1463 = vrot.lane.b32.xlu0 %v1373_v41, %s2027_s5 }
0x1298   :  { %v1386_v46 = vpop.permute.xlu1 %1385 }
0x1299   :  { %v1388_v48 = vmul.f32 %v2146_v24, %v1386_v46 }
0x129b   :  { %v1459_v49 = vadd.f32 %v1458_v35, %v1388_v48 }
0x129d   :  { %v1462_v50 = vadd.f32 %v2152_v28, %v1459_v49 }
0x12fe   :  { %v1464_v42 = vpop.permute.xlu0 %1463 }
0x12ff   :  { %1867 = vmatmul.mubr.msk.f32.vlgmr.msra.gmra.mrb[14].mxu1 %vm51_vm1, %v1464_v42 }
0x13d2   :  { %v1533_v43 = vpop.f32.mrb[14].mxu1 }
0x13d3   :  { %v1544_v44 = vadd.f32 %v1533_v43, %v2139_v18  ;;  %v1868_v45 = vpop.f32.mrb[15].mxu1  ;;  %v1537_v51 = vadd.f32 %v1533_v43, %v1462_v50 }
0x13d5   :  { %1546 = vrot.lane.b32.xlu0 %v1544_v44, %s2026_s4  ;;  %v1612_v52 = vmul.f32 -1.442695, %v1537_v51 }
0x13d7   :  { %2016 = vpow2.f32 %v1612_v52 }
0x13e1   :  { %v2017_v53 = vpop.eup %2016 }
0x13e2   :  { %v1541_v54 = vadd.f32 1.0, %v2017_v53 }
0x13e4   :  { %2018 = vrcp.f32 %v1541_v54 }
0x13ee   :  { %v2019_v55 = vpop.eup %2018 }
0x13ef   :  { %v1562_v59 = vmul.f32 %v2019_v55, %v1373_v41 }
0x1447   :  { %v1547_v56 = vpop.permute.xlu0 %1546 }
0x1448   :  { %v1549_v4 = vmul.f32 %v2019_v55, %v1547_v56 }
0x144a   :  { %1551 = vrot.lane.b32.xlu1 %v1549_v4, %s2026_s4 }
0x144e   :  { %618 = vrot.lane.b32.xlu1 %v2232_v47, %s2028_s1 }
0x1452   :  { %809 = vrot.lane.b32.xlu1 %v2263_v16, %s2026_s4  ;;  %v1556_v16 = vsub.f32 1.0, %v2019_v55 }
0x14bc   :  { %v1552_v18 = vpop.permute.xlu1 %1551 }
0x14bd   :  { %v1554_v24 = vadd.f32 %v1552_v18, %v1462_v50 }
0x14bf   :  { %2020 = vtanh.f32 %v1554_v24 }
0x14c0   :  { %v619_v28 = vpop.permute.xlu1 %618 }
0x14c1   :  { %622 = vst.msk [vmem:[%s2381_s7] sm:$0xf] %vm621_vm4, %v619_v28 }
0x14c4   :  { %v810_v57 = vpop.permute.xlu1 %809 }
0x14c5   :  { %813 = vst.msk [vmem:[%s2381_s7] sm:$0xf] %vm812_vm5, %v810_v57 }
0x14c9   :  { %v2021_v47 = vpop.eup %2020 }
0x14ca   :  { %1558 = vrot.lane.b32.xlu0 %v2021_v47, %s2027_s5 }
0x14ce   :  { %1375 = vrot.lane.b32.xlu0 %v1373_v41, %s2028_s1 }
0x153c   :  { %v1559_v58 = vpop.permute.xlu0 %1558 }
0x153d   :  { %v1561_v60 = vmul.f32 %v1559_v58, %v1556_v16 }
0x153f   :  { %v1563_v13 = vadd.f32 %v1562_v59, %v1561_v60 }
0x1540   :  { %v1376_v61 = vpop.permute.xlu0 %1375 }
0x1541   :  { %1378 = vst.msk [vmem:[%s2381_s7 + $0x4] sm:$0xf] %vm621_vm4, %v1376_v61  ;;  %1565 = vrot.lane.b32.xlu0 %v1563_v13, %s2026_s4 }
0x15b3   :  { %v1566_v62 = vpop.permute.xlu0 %1565 }
0x15b4   :  { %1568 = vst.msk [vmem:[%s2381_s7 + $0x4] sm:$0xf] %vm812_vm5, %v1566_v62 }

</bundles_post_ra>
